<compile_context>
chip_gen: v5e
topology: v5e:2x2
jax: 0.10.0
libtpu: 0.0.40
codegen_flags: <defaults>
</compile_context>

<pallas_src>
import math

import jax
import jax.numpy as jnp
from jax import lax
from jax.experimental import pallas as pl
from jax.experimental.pallas import tpu as pltpu

_OFF_HEAD = -1e30  # off-head additive bias; must dominate the ~±3e4 mask term


def _attn_kernel(x_ref, xt_ref, bias_ref, wqk_ref, bqk_ref, o_ref):
    # x_ref   : (N, D)   flattened tokens, N = B*H*S (row-major over b, h, s)
    # xt_ref  : (D, N)   same data, transposed (for the lane-dense output pass)
    # bias_ref: (N, N)   block-diagonal additive bias (per-head blocks hold
    #                    -10000*mask, off-head blocks hold -1e30)
    # wqk_ref : (D, 2D)  [Wq^T | Wk^T]  (projection is x @ W)
    # bqk_ref : (1, 2D)  [bq | bk]
    # o_ref   : (D, N)   output, transposed -> lane-dense (8, 128) slab
    N, D = x_ref.shape

    # Fused Q/K projection: ONE (N,D)x(D,2D) MXU pass; weights/bias read once.
    qk = jnp.dot(x_ref[...], wqk_ref[...],
                 preferred_element_type=jnp.float32) + bqk_ref[...]     # (N, 2D)
    q2d = qk[:, :D]                                                     # (N, D)
    k2d = qk[:, D:]                                                     # (N, D)

    # Full-width scores: ONE MXU pass contracting the last dims (q @ k^T for
    # every row pair).  Off-head entries are garbage but receive the -1e30
    # bias below and vanish in the softmax.
    scale = 1.0 / math.sqrt(D)
    scores = lax.dot_general(q2d, k2d, (((1,), (1,)), ((), ())),
                             preferred_element_type=jnp.float32) * scale
    scores = scores + bias_ref[...]                                     # (N, N)

    # Numerically-stable row softmax over the full 128-lane row; off-head
    # columns underflow to exactly 0.
    m = jnp.max(scores, axis=-1, keepdims=True)
    p = jnp.exp(scores - m)
    denom = jnp.sum(p, axis=-1, keepdims=True)
    attn = p * pl.reciprocal(denom, approx=True)      # divide on the EUP slot

    # Output, transposed: out_t[d, n] = sum_k x[k, d] * attn[n, k].
    # ONE (D,N)x(N,N) MXU pass landing directly in a lane-dense (8,128) slab
    # -> a single unmasked vector store (off-head attn is exactly 0).
    out_t = lax.dot_general(xt_ref[...], attn, (((1,), (1,)), ((), ())),
                            preferred_element_type=jnp.float32)         # (D, N)
    o_ref[...] = out_t.astype(o_ref.dtype)


def _build_block_bias(mask, B, H, S):
    """(B,1,S,S) mask -> (B*H*S, B*H*S) additive bias.

    Per-head diagonal (S,S) blocks hold -10000*mask (head-broadcast);
    off-head blocks hold -1e30 so cross-head attention is exactly zero."""
    m = mask.reshape(B, S, S).astype(jnp.float32) * (-10000.0)           # (B,S,S)
    m = jnp.broadcast_to(m[:, None], (B, H, S, S)).reshape(B * H, S, S)  # (BH,S,S)
    BH = B * H
    bias = jnp.full((BH, S, BH, S), _OFF_HEAD, dtype=jnp.float32)
    idx = jnp.arange(BH)
    bias = bias.at[idx, :, idx, :].set(m)
    return bias.reshape(BH * S, BH * S)


def attention_forward(x, mask, wq, bq, wk, bk):
    """x: (B, H, S, D) f32; mask: (B, 1, S, S) f32.
    wq/wk: (D, D) already transposed (y = x @ W); bq/bk: (1, D)."""
    B, H, S, D = x.shape
    N = B * H * S

    # Wrapper-side layout plumbing (all invariants packed once, outside kernel):
    x2d = x.reshape(N, D)                       # (128, 8) tokens for projection
    xt = jnp.transpose(x2d)                     # (8, 128) for the output pass
    bias = _build_block_bias(mask, B, H, S)     # (128, 128) block-diagonal bias
    wqk = jnp.concatenate([wq, wk], axis=1)     # (8, 16)  fused Q/K weights
    bqk = jnp.concatenate([bq, bk], axis=1)     # (1, 16)  fused Q/K biases

    out_t = pl.pallas_call(
        _attn_kernel,
        out_shape=jax.ShapeDtypeStruct((D, N), x.dtype),
        in_specs=[pl.BlockSpec(memory_space=pltpu.MemorySpace.VMEM)
                  for _ in range(5)],
        out_specs=pl.BlockSpec(memory_space=pltpu.MemorySpace.VMEM),
    )(x2d, xt, bias, wqk, bqk)

    # Unpack (D, B*H*S) -> (B, H, S, D).  Layout plumbing, not compute.
    return jnp.transpose(out_t.reshape(D, B, H, S), (1, 2, 3, 0))


def reference_forward(x, mask, wq, bq, wk, bk):
    q = jnp.einsum("bhsd,de->bhse", x, wq) + bq
    k = jnp.einsum("bhsd,de->bhse", x, wk) + bk
    s = jnp.einsum("bhqd,bhkd->bhqk", q, k) / math.sqrt(x.shape[-1])
    s = s + mask * (-10000.0)
    a = jax.nn.softmax(s, axis=-1)
    return jnp.einsum("bhqk,bhkd->bhqd", a, x)


if __name__ == "__main__":
    # Small shapes consistent with the module: Linear(8, 8) fixes D = 8.
    B, H, S, D = 2, 4, 16, 8

    key = jax.random.PRNGKey(0)
    kx, km, kwq, kbq, kwk, kbk = jax.random.split(key, 6)

    x = jax.random.normal(kx, (B, H, S, D), dtype=jnp.float32)
    attention_mask = jax.random.normal(km, (B, 1, S, S), dtype=jnp.float32)

    # Deterministic Linear(8, 8) params (PyTorch stores W as (out, in); pass W^T).
    bound = 1.0 / math.sqrt(D)
    wq_pt = jax.random.uniform(kwq, (D, D), jnp.float32, -bound, bound)
    bq = jax.random.uniform(kbq, (1, D), jnp.float32, -bound, bound)
    wk_pt = jax.random.uniform(kwk, (D, D), jnp.float32, -bound, bound)
    bk = jax.random.uniform(kbk, (1, D), jnp.float32, -bound, bound)
    wq = wq_pt.T
    wk = wk_pt.T

    out = attention_forward(x, attention_mask, wq, bq, wk, bk)
    out = jax.block_until_ready(out)

    ref = reference_forward(x, attention_mask, wq, bq, wk, bk)
    assert out.shape == (B, H, S, D)
    # Tolerance loosened vs. 1e-4 because the softmax divide now uses the EUP
    # approximate reciprocal (pl.reciprocal(approx=True)).
    assert jnp.allclose(out, ref, atol=1e-2, rtol=1e-2), "mismatch vs reference"

    print("KERNEL_OK")
</pallas_src>

<mosaic_0001>
module attributes {stable_mosaic.version = 11 : i64} {
  func.func @_attn_kernel(%arg0: memref<128x8xf32, #tpu.memory_space<vmem>>, %arg1: memref<8x128xf32, #tpu.memory_space<vmem>>, %arg2: memref<128x128xf32, #tpu.memory_space<vmem>>, %arg3: memref<8x16xf32, #tpu.memory_space<vmem>>, %arg4: memref<1x16xf32, #tpu.memory_space<vmem>>, %arg5: memref<8x128xf32, #tpu.memory_space<vmem>>) attributes {dimension_semantics = [], scalar_prefetch = 0 : i64, scratch_operands = 0 : i64, tpu.core_type = #tpu.core_type<tc>} {
    %c0 = arith.constant 0 : index
    %c0_0 = arith.constant 0 : index
    %0 = vector.load %arg0[%c0, %c0_0] : memref<128x8xf32, #tpu.memory_space<vmem>>, vector<128x8xf32>
    %c0_1 = arith.constant 0 : index
    %c0_2 = arith.constant 0 : index
    %1 = vector.load %arg3[%c0_1, %c0_2] : memref<8x16xf32, #tpu.memory_space<vmem>>, vector<8x16xf32>
    %cst = arith.constant dense<0.000000e+00> : vector<128x16xf32>
    %2 = tpu.matmul %0, %1, %cst {dimension_numbers = #tpu.dot_dimension_numbers<[1], [0], [0], [1], [0, 0, 1, 1], [], []>} : vector<128x8xf32>, vector<8x16xf32>, vector<128x16xf32> -> vector<128x16xf32>
    %c0_3 = arith.constant 0 : index
    %c0_4 = arith.constant 0 : index
    %3 = vector.load %arg4[%c0_3, %c0_4] : memref<1x16xf32, #tpu.memory_space<vmem>>, vector<1x16xf32>
    %4 = vector.broadcast %3 : vector<1x16xf32> to vector<128x16xf32>
    %5 = arith.addf %2, %4 : vector<128x16xf32>
    %6 = vector.extract_strided_slice %5 {offsets = [0, 0], sizes = [128, 8], strides = [1, 1]} : vector<128x16xf32> to vector<128x8xf32>
    %7 = vector.extract_strided_slice %5 {offsets = [0, 8], sizes = [128, 8], strides = [1, 1]} : vector<128x16xf32> to vector<128x8xf32>
    %cst_5 = arith.constant dense<0.000000e+00> : vector<128x128xf32>
    %8 = tpu.matmul %6, %7, %cst_5 {dimension_numbers = #tpu.dot_dimension_numbers<[1], [1], [0], [0], [0, 0, 1, 0], [], []>} : vector<128x8xf32>, vector<128x8xf32>, vector<128x128xf32> -> vector<128x128xf32>
    %cst_6 = arith.constant 0.353553385 : f32
    %9 = vector.broadcast %cst_6 : f32 to vector<128x128xf32>
    %10 = arith.mulf %8, %9 : vector<128x128xf32>
    %c0_7 = arith.constant 0 : index
    %c0_8 = arith.constant 0 : index
    %11 = vector.load %arg2[%c0_7, %c0_8] : memref<128x128xf32, #tpu.memory_space<vmem>>, vector<128x128xf32>
    %12 = arith.addf %10, %11 : vector<128x128xf32>
    %cst_9 = arith.constant dense<0xFF800000> : vector<128xf32>
    %13 = vector.multi_reduction <maximumf>, %12, %cst_9 [1] : vector<128x128xf32> to vector<128xf32>
    %14 = vector.shape_cast %13 : vector<128xf32> to vector<128x1xf32>
    %15 = vector.broadcast %14 : vector<128x1xf32> to vector<128x128xf32>
    %16 = arith.subf %12, %15 : vector<128x128xf32>
    %17 = math.exp %16 : vector<128x128xf32>
    %cst_10 = arith.constant dense<0.000000e+00> : vector<128xf32>
    %18 = vector.multi_reduction <add>, %17, %cst_10 [1] : vector<128x128xf32> to vector<128xf32>
    %19 = vector.shape_cast %18 : vector<128xf32> to vector<128x1xf32>
    %20 = tpu.reciprocal %19 {approx = true} : vector<128x1xf32> -> vector<128x1xf32>
    %21 = vector.broadcast %20 : vector<128x1xf32> to vector<128x128xf32>
    %22 = arith.mulf %17, %21 : vector<128x128xf32>
    %c0_11 = arith.constant 0 : index
    %c0_12 = arith.constant 0 : index
    %23 = vector.load %arg1[%c0_11, %c0_12] : memref<8x128xf32, #tpu.memory_space<vmem>>, vector<8x128xf32>
    %cst_13 = arith.constant dense<0.000000e+00> : vector<8x128xf32>
    %24 = tpu.matmul %23, %22, %cst_13 {dimension_numbers = #tpu.dot_dimension_numbers<[1], [1], [0], [0], [0, 0, 1, 0], [], []>} : vector<8x128xf32>, vector<128x128xf32>, vector<8x128xf32> -> vector<8x128xf32>
    %c0_14 = arith.constant 0 : index
    %c0_15 = arith.constant 0 : index
    %25 = vector.load %arg5[%c0_14, %c0_15] : memref<8x128xf32, #tpu.memory_space<vmem>>, vector<8x128xf32>
    tpu.vector_store %arg5[%c0_14, %c0_15], %24 {strides = array<i32>} : memref<8x128xf32, #tpu.memory_space<vmem>>, vector<8x128xf32>,
    return
  }
}

</mosaic_0001>

<bundles_post_ra>
// kernel: tpu_custom_call.1
= control target key start
LH: loop header
LB: loop body
LE: loop exit
PB: predicated region body
PF: predicated region fallthrough
CT: control target
= control target key end

     0   :  { %10 = vsyncpa [#allocation3], 0  ;;  %s1133_s0 = inlined_call_operand.vmem [shape: f32[128,8], index: 0, kind: input, shape index: {}]   ;;  %s1134_s1 = inlined_call_operand.vmem [shape: f32[8,128], index: 1, kind: input, shape index: {}]   ;;  %s1135_s2 = inlined_call_operand.vmem [shape: f32[128,128], index: 2, kind: input, shape index: {}]   ;;  %s1136_s3 = inlined_call_operand.hbm [shape: f32[8,16], index: 3, kind: input, shape index: {}]   ;;  %s1137_s4 = inlined_call_operand.vmem [shape: f32[1,16], index: 4, kind: input, shape index: {}]   ;;  %s1138_s5 = inlined_call_operand.hbm [shape: f32[8,128], index: 5, kind: output, shape index: {}]  }
   0x1   :  { %11 = vsyncpa [#allocation4], 0  ;;  %s23_s20 = sshll.u32 %s1136_s3, 4  ;;  %s762_s21 = smov [#allocation2]   ;;  %s24_s20 = int_to_ptr.hbm [resolvable:$true] %s23_s20 }
   0x2   :  { %s25_s22 = sshll.u32 %s762_s21, 4  ;;  %s26_s22 = int_to_ptr.vmem [resolvable:$true] %s25_s22 }
   0x3   :  { %28 = dma.hbm_to_vmem [thread:$0]  %s24_s20, 128, %s26_s22, [#allocation3]  }
   0x4   :  { %758 = dma.done.wait [#allocation3], 128  }
   0x5   :  { %759 = vsyncadd [#allocation3], 4294967168  ;;  %vm56_vm0 = vcmask 64512   ;;  %v51_v0 = vld [vmem:[#allocation2] sm:$0xff]  ;;  %v36_v2 = vld [vmem:[%s1133_s0 + $0x8] sm:$0xff]  ;;  %s764_s9 = smov [#allocation5]  }
   0x6   :  { %v35_v1 = vld [vmem:[%s1133_s0] sm:$0xff]  ;;  %120 = vmatpush.msra.mxu0 %v51_v0  ;;  %v37_v3 = vld [vmem:[%s1133_s0 + $0x10] sm:$0xff]  ;;  %v38_v4 = vld [vmem:[%s1133_s0 + $0x18] sm:$0xff]  ;;  %s566_s10 = sshll.u32 %s764_s9, 4  ;;  %s568_s13 = sshll.u32 %s1138_s5, 4  ;;  %s567_s10 = int_to_ptr.vmem [resolvable:$true] %s566_s10  ;;  %s569_s13 = int_to_ptr.hbm [resolvable:$true] %s568_s13 }
   0x7   :  { %578 = vmatmul.msk.f32.vlgmr.msra.gmra.mxu0 %vm56_vm0, %v35_v1  ;;  %v39_v5 = vld [vmem:[%s1133_s0 + $0x20] sm:$0xff]  ;;  %v40_v6 = vld [vmem:[%s1133_s0 + $0x28] sm:$0xff]  ;;  %v41_v7 = vld [vmem:[%s1133_s0 + $0x30] sm:$0xff] }
   0x8   :  { %v42_v8 = vld [vmem:[%s1133_s0 + $0x38] sm:$0xff]  ;;  %v43_v9 = vld [vmem:[%s1133_s0 + $0x40] sm:$0xff]  ;;  %v44_v10 = vld [vmem:[%s1133_s0 + $0x48] sm:$0xff] }
   0x9   :  { %v45_v11 = vld [vmem:[%s1133_s0 + $0x50] sm:$0xff]  ;;  %v46_v12 = vld [vmem:[%s1133_s0 + $0x58] sm:$0xff]  ;;  %v47_v13 = vld [vmem:[%s1133_s0 + $0x60] sm:$0xff] }
   0xa   :  { %v48_v14 = vld [vmem:[%s1133_s0 + $0x68] sm:$0xff]  ;;  %v49_v15 = vld [vmem:[%s1133_s0 + $0x70] sm:$0xff]  ;;  %v50_v16 = vld [vmem:[%s1133_s0 + $0x78] sm:$0xff]  ;;  %s763_s0 = smov 120  }
   0xb   :  { %v645_v28 = vld [vmem:[%s1137_s4] ss:$0 sm:$0xff] }
   0xf   :  { %579 = vmatmul.msk.f32.gmra.mxu0 %vm56_vm0, %v36_v2 }
  0x17   :  { %580 = vmatmul.msk.f32.gmra.mxu0 %vm56_vm0, %v37_v3 }
  0x1f   :  { %581 = vmatmul.msk.f32.gmra.mxu0 %vm56_vm0, %v38_v4 }
  0x27   :  { %582 = vmatmul.msk.f32.gmra.mxu0 %vm56_vm0, %v39_v5 }
  0x2f   :  { %583 = vmatmul.msk.f32.gmra.mxu0 %vm56_vm0, %v40_v6 }
  0x37   :  { %584 = vmatmul.msk.f32.gmra.mxu0 %vm56_vm0, %v41_v7 }
  0x3f   :  { %585 = vmatmul.msk.f32.gmra.mxu0 %vm56_vm0, %v42_v8 }
  0x47   :  { %586 = vmatmul.msk.f32.gmra.mxu0 %vm56_vm0, %v43_v9 }
  0x4f   :  { %587 = vmatmul.msk.f32.gmra.mxu0 %vm56_vm0, %v44_v10 }
  0x57   :  { %588 = vmatmul.msk.f32.gmra.mxu0 %vm56_vm0, %v45_v11 }
  0x5f   :  { %589 = vmatmul.msk.f32.gmra.mxu0 %vm56_vm0, %v46_v12 }
  0x67   :  { %590 = vmatmul.msk.f32.gmra.mxu0 %vm56_vm0, %v47_v13 }
  0x6f   :  { %591 = vmatmul.msk.f32.gmra.mxu0 %vm56_vm0, %v48_v14  ;;  %v376_v14 = vld [vmem:[%s1135_s2 + $0x68] sm:$0xff] }
  0x77   :  { %592 = vmatmul.msk.f32.gmra.mxu0 %vm56_vm0, %v49_v15 }
  0x7f   :  { %593 = vmatmul.msk.f32.gmra.mxu0 %vm56_vm0, %v50_v16 }
  0x84   :  { %v122_v17 = vpop.f32.mrf.mxu0 }
  0x85   :  { %v123_v49 = vadd.f32 %v645_v28, %v122_v17 }
  0x8c   :  { %v125_v18 = vpop.f32.mrf.mxu0 }
  0x8d   :  { %v893_v42 = vadd.f32 %v645_v28, %v125_v18 }
  0x94   :  { %v128_v19 = vpop.f32.mrf.mxu0 }
  0x95   :  { %v129_v45 = vadd.f32 %v645_v28, %v128_v19 }
  0x9c   :  { %v131_v20 = vpop.f32.mrf.mxu0 }
  0x9d   :  { %v132_v48 = vadd.f32 %v645_v28, %v131_v20  ;;  %v372_v20 = vld [vmem:[%s1135_s2 + $0x48] sm:$0xff] }
  0xa4   :  { %v134_v21 = vpop.f32.mrf.mxu0 }
  0xa5   :  { %v881_v37 = vadd.f32 %v645_v28, %v134_v21  ;;  %v377_v21 = vld [vmem:[%s1135_s2 + $0x70] sm:$0xff] }
  0xac   :  { %v137_v22 = vpop.f32.mrf.mxu0 }
  0xad   :  { %v901_v43 = vadd.f32 %v645_v28, %v137_v22 }
  0xb4   :  { %v140_v23 = vpop.f32.mrf.mxu0 }
  0xb5   :  { %v911_v47 = vadd.f32 %v645_v28, %v140_v23 }
  0xbc   :  { %v143_v24 = vpop.f32.mrf.mxu0 }
  0xbd   :  { %v873_v34 = vadd.f32 %v645_v28, %v143_v24 }
  0xc4   :  { %v146_v25 = vpop.f32.mrf.mxu0 }
  0xc5   :  { %v889_v40 = vadd.f32 %v645_v28, %v146_v25 }
  0xcc   :  { %v149_v26 = vpop.f32.mrf.mxu0 }
  0xcd   :  { %v150_v46 = vadd.f32 %v645_v28, %v149_v26 }
  0xd4   :  { %v152_v27 = vpop.f32.mrf.mxu0 }
  0xd5   :  { %v869_v32 = vadd.f32 %v645_v28, %v152_v27 }
  0xdc   :  { %v155_v29 = vpop.f32.mrf.mxu0 }
  0xdd   :  { %v865_v30 = vadd.f32 %v645_v28, %v155_v29  ;;  %v375_v29 = vld [vmem:[%s1135_s2 + $0x60] sm:$0xff] }
  0xdf   :  { %208 = vrot.lane.b32.xlu2 %v865_v30, %s763_s0 }
  0xe4   :  { %v158_v31 = vpop.f32.mrf.mxu0 }
  0xe5   :  { %v883_v38 = vadd.f32 %v645_v28, %v158_v31 }
  0xe7   :  { %206 = vrot.lane.b32.xlu2 %v869_v32, %s763_s0 }
  0xec   :  { %v161_v33 = vpop.f32.mrf.mxu0 }
  0xed   :  { %v875_v35 = vadd.f32 %v645_v28, %v161_v33 }
  0xef   :  { %212 = vrot.lane.b32.xlu1 %v875_v35, %s763_s0  ;;  %200 = vrot.lane.b32.xlu2 %v873_v34, %s763_s0 }
  0xf4   :  { %v164_v36 = vpop.f32.mrf.mxu0 }
  0xf5   :  { %v903_v44 = vadd.f32 %v645_v28, %v164_v36 }
  0xf7   :  { %210 = vrot.lane.b32.xlu1 %v883_v38, %s763_s0  ;;  %194 = vrot.lane.b32.xlu2 %v881_v37, %s763_s0 }
  0xfc   :  { %v167_v39 = vpop.f32.mrf.mxu0 }
  0xfd   :  { %v891_v41 = vadd.f32 %v645_v28, %v167_v39  ;;  %v373_v39 = vld [vmem:[%s1135_s2 + $0x50] sm:$0xff] }
  0xff   :  { %216 = vrot.lane.b32.xlu0 %v891_v41, %s763_s0  ;;  %202 = vrot.lane.b32.xlu1 %v889_v40, %s763_s0 }
 0x100   :  { %188 = vrot.lane.b32.xlu2 %v893_v42, %s763_s0 }
 0x107   :  { %214 = vrot.lane.b32.xlu0 %v903_v44, %s763_s0  ;;  %196 = vrot.lane.b32.xlu1 %v901_v43, %s763_s0 }
 0x10f   :  { %204 = vrot.lane.b32.xlu0 %v150_v46, %s763_s0  ;;  %190 = vrot.lane.b32.xlu1 %v129_v45, %s763_s0 }
 0x117   :  { %198 = vrot.lane.b32.xlu0 %v911_v47, %s763_s0 }
 0x11f   :  { %192 = vrot.lane.b32.xlu0 %v132_v48, %s763_s0 }
 0x127   :  { %186 = vrot.lane.b32.xlu0 %v123_v49, %s763_s0 }
 0x139   :  { %v209_v53 = vpop.permute.xlu2 %208 }
 0x141   :  { %v207_v55 = vpop.permute.xlu2 %206 }
 0x149   :  { %v201_v58 = vpop.permute.xlu2 %200 }
 0x151   :  { %v195_v61 = vpop.permute.xlu2 %194 }
 0x15a   :  { %v189_v0 = vpop.permute.xlu2 %188 }
 0x161   :  { %v213_v51 = vpop.permute.xlu1 %212 }
 0x169   :  { %v211_v54 = vpop.permute.xlu1 %210 }
 0x171   :  { %v217_v50 = vpop.permute.xlu0 %216  ;;  %v203_v57 = vpop.permute.xlu1 %202 }
 0x172   :  { %594 = vmatpush.xpose.msk.msra.mxu1 %vm56_vm0, %v217_v50  ;;  %626 = vmatpush.xpose.msk.msra.mxu3 %vm56_vm0, %v217_v50 }
 0x179   :  { %v215_v52 = vpop.permute.xlu0 %214  ;;  %v197_v60 = vpop.permute.xlu1 %196 }
 0x17a   :  { %595 = vmatpush.xpose.msk.msra.mxu1 %vm56_vm0, %v215_v52  ;;  %627 = vmatpush.xpose.msk.msra.mxu3 %vm56_vm0, %v215_v52 }
 0x17e   :  { %596 = vmatpush.xpose.msk.msra.mxu1 %vm56_vm0, %v213_v51  ;;  %628 = vmatpush.xpose.msk.msra.mxu3 %vm56_vm0, %v213_v51 }
 0x181   :  { %v205_v56 = vpop.permute.xlu0 %204  ;;  %v191_v63 = vpop.permute.xlu1 %190 }
 0x182   :  { %597 = vmatpush.xpose.msk.msra.mxu1 %vm56_vm0, %v211_v54  ;;  %629 = vmatpush.xpose.msk.msra.mxu3 %vm56_vm0, %v211_v54  ;;  %v368_v54 = vld [vmem:[%s1135_s2 + $0x28] sm:$0xff] }
 0x186   :  { %598 = vmatpush.xpose.msk.msra.mxu1 %vm56_vm0, %v209_v53  ;;  %630 = vmatpush.xpose.msk.msra.mxu3 %vm56_vm0, %v209_v53  ;;  %v367_v53 = vld [vmem:[%s1135_s2 + $0x20] sm:$0xff] }
 0x189   :  { %v199_v59 = vpop.permute.xlu0 %198 }
 0x18a   :  { %599 = vmatpush.xpose.msk.msra.mxu1 %vm56_vm0, %v207_v55  ;;  %631 = vmatpush.xpose.msk.msra.mxu3 %vm56_vm0, %v207_v55 }
 0x18e   :  { %600 = vmatpush.xpose.msk.msra.mxu1 %vm56_vm0, %v205_v56  ;;  %632 = vmatpush.xpose.msk.msra.mxu3 %vm56_vm0, %v205_v56 }
 0x191   :  { %v193_v62 = vpop.permute.xlu0 %192 }
 0x192   :  { %601 = vmatpush.xpose.msk.msra.mxu1 %vm56_vm0, %v203_v57  ;;  %633 = vmatpush.xpose.msk.msra.mxu3 %vm56_vm0, %v203_v57 }
 0x196   :  { %602 = vmatpush.xpose.msk.msra.mxu1 %vm56_vm0, %v201_v58  ;;  %634 = vmatpush.xpose.msk.msra.mxu3 %vm56_vm0, %v201_v58  ;;  %v365_v58 = vld [vmem:[%s1135_s2 + $0x10] sm:$0xff] }
 0x199   :  { %v187_v1 = vpop.permute.xlu0 %186 }
 0x19a   :  { %603 = vmatpush.xpose.msk.msra.mxu1 %vm56_vm0, %v199_v59  ;;  %635 = vmatpush.xpose.msk.msra.mxu3 %vm56_vm0, %v199_v59 }
 0x19e   :  { %604 = vmatpush.xpose.msk.msra.mxu1 %vm56_vm0, %v197_v60  ;;  %636 = vmatpush.xpose.msk.msra.mxu3 %vm56_vm0, %v197_v60 }
 0x1a2   :  { %605 = vmatpush.xpose.msk.msra.mxu1 %vm56_vm0, %v195_v61  ;;  %637 = vmatpush.xpose.msk.msra.mxu3 %vm56_vm0, %v195_v61 }
 0x1a6   :  { %606 = vmatpush.xpose.msk.msra.mxu1 %vm56_vm0, %v193_v62  ;;  %638 = vmatpush.xpose.msk.msra.mxu3 %vm56_vm0, %v193_v62 }
 0x1aa   :  { %607 = vmatpush.xpose.msk.msra.mxu1 %vm56_vm0, %v191_v63  ;;  %639 = vmatpush.xpose.msk.msra.mxu3 %vm56_vm0, %v191_v63 }
 0x1ae   :  { %608 = vmatpush.xpose.msk.msra.mxu1 %vm56_vm0, %v189_v0  ;;  %640 = vmatpush.xpose.msk.msra.mxu3 %vm56_vm0, %v189_v0 }
 0x1b2   :  { %609 = vmatpush.xpose.msk.msra.mxu1 %vm56_vm0, %v187_v1  ;;  %641 = vmatpush.xpose.msk.msra.mxu3 %vm56_vm0, %v187_v1 }
 0x1b5   :  { %610 = vmatmul.msk.f32.vlgmr.msra.gmra.mxu1 %vm56_vm0, %v123_v49  ;;  %617 = vmatmul.msk.f32.vlgmr.msra.gmra.mxu3 %vm56_vm0, %v873_v34 }
 0x1bd   :  { %611 = vmatmul.msk.f32.gmra.mxu1 %vm56_vm0, %v893_v42  ;;  %618 = vmatmul.msk.f32.gmra.mxu3 %vm56_vm0, %v889_v40  ;;  %v374_v40 = vld [vmem:[%s1135_s2 + $0x58] sm:$0xff] }
 0x1c5   :  { %612 = vmatmul.msk.f32.gmra.mxu1 %vm56_vm0, %v129_v45  ;;  %619 = vmatmul.msk.f32.gmra.mxu3 %vm56_vm0, %v150_v46 }
 0x1cd   :  { %613 = vmatmul.msk.f32.gmra.mxu1 %vm56_vm0, %v132_v48  ;;  %620 = vmatmul.msk.f32.gmra.mxu3 %vm56_vm0, %v869_v32  ;;  %v369_v32 = vld [vmem:[%s1135_s2 + $0x30] sm:$0xff]  ;;  %v371_v48 = vld [vmem:[%s1135_s2 + $0x40] sm:$0xff] }
 0x1d5   :  { %614 = vmatmul.msk.f32.gmra.mxu1 %vm56_vm0, %v881_v37  ;;  %621 = vmatmul.msk.f32.gmra.mxu3 %vm56_vm0, %v865_v30  ;;  %v378_v30 = vld [vmem:[%s1135_s2 + $0x78] sm:$0xff] }
 0x1dd   :  { %615 = vmatmul.msk.f32.gmra.mxu1 %vm56_vm0, %v901_v43  ;;  %622 = vmatmul.msk.f32.gmra.mxu3 %vm56_vm0, %v883_v38 }
 0x1e5   :  { %616 = vmatmul.msk.f32.gmra.mxu1 %vm56_vm0, %v911_v47  ;;  %623 = vmatmul.msk.f32.gmra.mxu3 %vm56_vm0, %v875_v35  ;;  %v370_v47 = vld [vmem:[%s1135_s2 + $0x38] sm:$0xff] }
 0x1ed   :  { %624 = vmatmul.msk.f32.gmra.mxu3 %vm56_vm0, %v903_v44 }
 0x1f5   :  { %625 = vmatmul.msk.f32.gmra.mxu3 %vm56_vm0, %v891_v41  ;;  %v366_v41 = vld [vmem:[%s1135_s2 + $0x18] sm:$0xff] }
 0x232   :  { %v977_v3 = vpop.f32.mrf.mxu1 }
 0x238   :  { %v320_v2 = vpop.f32.mrf.mxu3 }
 0x239   :  { %v354_v45 = vmul.f32 0.35355338, %v320_v2 }
 0x23a   :  { %v979_v5 = vpop.f32.mrf.mxu1 }
 0x23b   :  { %v386_v49 = vadd.f32 %v370_v47, %v354_v45 }
 0x240   :  { %v323_v4 = vpop.f32.mrf.mxu3 }
 0x241   :  { %v355_v46 = vmul.f32 0.35355338, %v323_v4 }
 0x242   :  { %v305_v7 = vpop.f32.mrf.mxu1 }
 0x243   :  { %v387_v50 = vadd.f32 %v371_v48, %v355_v46  ;;  %v349_v57 = vmul.f32 0.35355338, %v305_v7 }
 0x245   :  { %v1041_v59 = vadd.f32 %v365_v58, %v349_v57 }
 0x248   :  { %v326_v6 = vpop.f32.mrf.mxu3 }
 0x249   :  { %v356_v18 = vmul.f32 0.35355338, %v326_v6 }
 0x24a   :  { %v308_v9 = vpop.f32.mrf.mxu1 }
 0x24b   :  { %v990_v23 = vadd.f32 %v372_v20, %v356_v18  ;;  %v350_v38 = vmul.f32 0.35355338, %v308_v9 }
 0x24d   :  { %v1017_v44 = vadd.f32 %v366_v41, %v350_v38 }
 0x250   :  { %v329_v8 = vpop.f32.mrf.mxu3 }
 0x251   :  { %v357_v36 = vmul.f32 0.35355338, %v329_v8 }
 0x252   :  { %v311_v12 = vpop.f32.mrf.mxu1 }
 0x253   :  { %v389_v42 = vadd.f32 %v373_v39, %v357_v36  ;;  %v351_v51 = vmul.f32 0.35355338, %v311_v12 }
 0x255   :  { %v1032_v55 = vadd.f32 %v367_v53, %v351_v51 }
 0x258   :  { %v332_v10 = vpop.f32.mrf.mxu3 }
 0x259   :  { %v358_v37 = vmul.f32 0.35355338, %v332_v10  ;;  %v347_v10 = vmul.f32 0.35355338, %v977_v3  ;;  %v348_v3 = vmul.f32 0.35355338, %v979_v5 }
 0x25a   :  { %v314_v16 = vpop.f32.mrf.mxu1 }
 0x25b   :  { %v390_v43 = vadd.f32 %v374_v40, %v358_v37  ;;  %v352_v52 = vmul.f32 0.35355338, %v314_v16 }
 0x25d   :  { %v1034_v56 = vadd.f32 %v368_v54, %v352_v52 }
 0x260   :  { %v335_v11 = vpop.f32.mrf.mxu3 }
 0x261   :  { %v359_v26 = vmul.f32 0.35355338, %v335_v11 }
 0x262   :  { %v317_v25 = vpop.f32.mrf.mxu1 }
 0x263   :  { %v353_v27 = vmul.f32 0.35355338, %v317_v25  ;;  %v1002_v33 = vadd.f32 %v375_v29, %v359_v26  ;;  %v364_v26 = vld [vmem:[%s1135_s2 + $0x8] sm:$0xff] }
 0x265   :  { %v1004_v35 = vadd.f32 %v369_v32, %v353_v27  ;;  %v1067_v32 = vadd.f32 %v364_v26, %v348_v3 }
 0x268   :  { %v338_v13 = vpop.f32.mrf.mxu3 }
 0x269   :  { %v360_v15 = vmul.f32 0.35355338, %v338_v13  ;;  %v363_v13 = vld [vmem:[%s1135_s2] sm:$0xff] }
 0x26a   :  { %v1054_v18 = vadd.f32 %v363_v13, %v347_v10 }
 0x26b   :  { %v392_v17 = vadd.f32 %v376_v14, %v360_v15 }
 0x26d   :  { %421 = vmax.xlane.f32.xlu0 %v392_v17 }
 0x270   :  { %v341_v19 = vpop.f32.mrf.mxu3 }
 0x271   :  { %v361_v22 = vmul.f32 0.35355338, %v341_v19 }
 0x273   :  { %v393_v24 = vadd.f32 %v377_v21, %v361_v22 }
 0x275   :  { %413 = vmax.xlane.f32.xlu0 %v990_v23  ;;  %423 = vmax.xlane.f32.xlu2 %v393_v24 }
 0x278   :  { %v344_v28 = vpop.f32.mrf.mxu3 }
 0x279   :  { %v362_v31 = vmul.f32 0.35355338, %v344_v28 }
 0x27b   :  { %v394_v34 = vadd.f32 %v378_v30, %v362_v31 }
 0x27d   :  { %419 = vmax.xlane.f32.xlu2 %v1002_v33  ;;  %425 = vmax.xlane.f32.xlu1 %v394_v34 }
 0x27e   :  { %407 = vmax.xlane.f32.xlu0 %v1004_v35 }
 0x285   :  { %415 = vmax.xlane.f32.xlu2 %v389_v42  ;;  %417 = vmax.xlane.f32.xlu1 %v390_v43 }
 0x286   :  { %401 = vmax.xlane.f32.xlu0 %v1017_v44 }
 0x28d   :  { %409 = vmax.xlane.f32.xlu2 %v386_v49  ;;  %411 = vmax.xlane.f32.xlu1 %v387_v50 }
 0x295   :  { %403 = vmax.xlane.f32.xlu2 %v1032_v55  ;;  %405 = vmax.xlane.f32.xlu1 %v1034_v56 }
 0x29d   :  { %399 = vmax.xlane.f32.xlu2 %v1041_v59 }
 0x2e0   :  { %v422_v60 = vpop.xlane.xlu0 %421 }
 0x2e1   :  { %v440_v61 = vsub.f32 %v392_v17, %v422_v60 }
 0x2e3   :  { %v469_v62 = vmul.f32 1.442695, %v440_v61 }
 0x2e5   :  { %646 = vpow2.f32 %v469_v62 }
 0x2e8   :  { %v424_v63 = vpop.xlane.xlu2 %423  ;;  %v414_v21 = vpop.xlane.xlu0 %413 }
 0x2e9   :  { %v441_v0 = vsub.f32 %v393_v24, %v424_v63  ;;  %v436_v5 = vsub.f32 %v990_v23, %v414_v21 }
 0x2eb   :  { %v1044_v1 = vpop.eup %646  ;;  %v471_v2 = vmul.f32 1.442695, %v441_v0 }
 0x2ec   :  { %501 = vadd.xlane.f32.xlu2 %v1044_v1 }
 0x2ed   :  { %648 = vpow2.f32 %v471_v2 }
 0x2f0   :  { %v420_v4 = vpop.xlane.xlu2 %419  ;;  %v426_v6 = vpop.xlane.xlu1 %425 }
 0x2f1   :  { %v442_v7 = vsub.f32 %v394_v34, %v426_v6  ;;  %v439_v20 = vsub.f32 %v1002_v33, %v420_v4  ;;  %v461_v34 = vmul.f32 1.442695, %v436_v5  ;;  %v408_v38 = vpop.xlane.xlu0 %407 }
 0x2f2   :  { %v433_v46 = vsub.f32 %v1004_v35, %v408_v38 }
 0x2f3   :  { %v473_v8 = vmul.f32 1.442695, %v442_v7  ;;  %v1047_v9 = vpop.eup %648  ;;  %v467_v22 = vmul.f32 1.442695, %v439_v20 }
 0x2f4   :  { %503 = vadd.xlane.f32.xlu0 %v1047_v9 }
 0x2f5   :  { %650 = vpow2.f32 %v473_v8 }
 0x2f8   :  { %v416_v11 = vpop.xlane.xlu2 %415  ;;  %v418_v12 = vpop.xlane.xlu1 %417 }
 0x2f9   :  { %v437_v14 = vsub.f32 %v389_v42, %v416_v11  ;;  %v438_v15 = vsub.f32 %v390_v43, %v418_v12  ;;  %v402_v52 = vpop.xlane.xlu0 %401 }
 0x2fa   :  { %v430_v35 = vsub.f32 %v1017_v44, %v402_v52 }
 0x2fb   :  { %v463_v16 = vmul.f32 1.442695, %v437_v14  ;;  %v465_v17 = vmul.f32 1.442695, %v438_v15  ;;  %v1056_v19 = vpop.eup %650 }
 0x2fc   :  { %505 = vadd.xlane.f32.xlu1 %v1056_v19  ;;  %395 = vmax.xlane.f32.xlu0 %v1054_v18 }
 0x2fd   :  { %652 = vpow2.f32 %v463_v16 }
 0x2fe   :  { %654 = vpow2.f32 %v465_v17 }
 0x2ff   :  { %656 = vpow2.f32 %v467_v22 }
 0x300   :  { %v410_v24 = vpop.xlane.xlu2 %409  ;;  %v412_v25 = vpop.xlane.xlu1 %411 }
 0x301   :  { %v434_v27 = vsub.f32 %v386_v49, %v410_v24  ;;  %v435_v28 = vsub.f32 %v387_v50, %v412_v25  ;;  %v455_v50 = vmul.f32 1.442695, %v433_v46 }
 0x303   :  { %v1065_v29 = vpop.eup %652  ;;  %v457_v30 = vmul.f32 1.442695, %v434_v27  ;;  %v459_v31 = vmul.f32 1.442695, %v435_v28 }
 0x304   :  { %v1069_v33 = vpop.eup %654  ;;  %397 = vmax.xlane.f32.xlu1 %v1067_v32  ;;  %495 = vadd.xlane.f32.xlu0 %v1065_v29 }
 0x305   :  { %658 = vpow2.f32 %v457_v30  ;;  %497 = vadd.xlane.f32.xlu2 %v1069_v33  ;;  %v1077_v41 = vpop.eup %656 }
 0x306   :  { %660 = vpow2.f32 %v459_v31 }
 0x307   :  { %662 = vpow2.f32 %v461_v34 }
 0x308   :  { %v404_v36 = vpop.xlane.xlu2 %403  ;;  %v406_v37 = vpop.xlane.xlu1 %405 }
 0x309   :  { %v431_v39 = vsub.f32 %v1032_v55, %v404_v36  ;;  %v432_v40 = vsub.f32 %v1034_v56, %v406_v37  ;;  %v449_v55 = vmul.f32 1.442695, %v430_v35 }
 0x30b   :  { %v1079_v23 = vpop.eup %658  ;;  %v451_v42 = vmul.f32 1.442695, %v431_v39  ;;  %v453_v43 = vmul.f32 1.442695, %v432_v40 }
 0x30c   :  { %v1081_v45 = vpop.eup %660  ;;  %499 = vadd.xlane.f32.xlu1 %v1077_v41  ;;  %489 = vadd.xlane.f32.xlu0 %v1079_v23 }
 0x30d   :  { %664 = vpow2.f32 %v451_v42  ;;  %491 = vadd.xlane.f32.xlu2 %v1081_v45  ;;  %v1088_v49 = vpop.eup %662 }
 0x30e   :  { %666 = vpow2.f32 %v453_v43 }
 0x310   :  { %v400_v47 = vpop.xlane.xlu2 %399 }
 0x311   :  { %v429_v48 = vsub.f32 %v1041_v59, %v400_v47 }
 0x313   :  { %v1090_v51 = vpop.eup %664  ;;  %v447_v53 = vmul.f32 1.442695, %v429_v48 }
 0x314   :  { %v1092_v54 = vpop.eup %666  ;;  %493 = vadd.xlane.f32.xlu1 %v1088_v49  ;;  %483 = vadd.xlane.f32.xlu0 %v1090_v51 }
 0x315   :  { %668 = vpow2.f32 %v447_v53  ;;  %485 = vadd.xlane.f32.xlu2 %v1092_v54 }
 0x316   :  { %670 = vpow2.f32 %v455_v50 }
 0x317   :  { %672 = vpow2.f32 %v449_v55 }
 0x31b   :  { %v1098_v56 = vpop.eup %668 }
 0x31c   :  { %v1100_v57 = vpop.eup %670 }
 0x31d   :  { %479 = vadd.xlane.f32.xlu2 %v1098_v56  ;;  %487 = vadd.xlane.f32.xlu1 %v1100_v57  ;;  %v1104_v58 = vpop.eup %672 }
 0x325   :  { %481 = vadd.xlane.f32.xlu1 %v1104_v58 }
 0x35f   :  { %v502_v63 = vpop.xlane.xlu2 %501 }
 0x367   :  { %v504_v59 = vpop.xlane.xlu0 %503 }
 0x36f   :  { %v506_v60 = vpop.xlane.xlu1 %505  ;;  %v396_v61 = vpop.xlane.xlu0 %395 }
 0x370   :  { %674 = vrcp.f32 %v506_v60  ;;  %v427_v44 = vsub.f32 %v1054_v18, %v396_v61 }
 0x371   :  { %676 = vrcp.f32 %v504_v59 }
 0x372   :  { %v443_v62 = vmul.f32 1.442695, %v427_v44 }
 0x374   :  { %678 = vpow2.f32 %v443_v62 }
 0x375   :  { %680 = vrcp.f32 %v502_v63 }
 0x376   :  { %v675_v0 = vpop.eup %674 }
 0x377   :  { %v398_v2 = vpop.xlane.xlu1 %397  ;;  %v538_v4 = vmul.f32 %v675_v0, %v1056_v19  ;;  %v677_v6 = vpop.eup %676 }
 0x378   :  { %v428_v7 = vsub.f32 %v1067_v32, %v398_v2  ;;  %v537_v11 = vmul.f32 %v677_v6, %v1047_v9  ;;  %v498_v15 = vpop.xlane.xlu2 %497  ;;  %v496_v17 = vpop.xlane.xlu0 %495 }
 0x379   :  { %540 = vmatpush.xpose.msra.mxu2 %v538_v4 }
 0x37a   :  { %v1110_v8 = vpop.eup %678  ;;  %v445_v10 = vmul.f32 1.442695, %v428_v7 }
 0x37b   :  { %475 = vadd.xlane.f32.xlu1 %v1110_v8  ;;  %v681_v12 = vpop.eup %680 }
 0x37c   :  { %682 = vpow2.f32 %v445_v10  ;;  %v536_v14 = vmul.f32 %v681_v12, %v1044_v1 }
 0x37d   :  { %541 = vmatpush.xpose.msra.mxu2 %v537_v11 }
 0x37f   :  { %v500_v13 = vpop.xlane.xlu1 %499 }
 0x380   :  { %684 = vrcp.f32 %v500_v13  ;;  %v492_v9 = vpop.xlane.xlu2 %491  ;;  %v490_v1 = vpop.xlane.xlu0 %489 }
 0x381   :  { %542 = vmatpush.xpose.msra.mxu2 %v536_v14  ;;  %686 = vrcp.f32 %v498_v15 }
 0x382   :  { %v683_v16 = vpop.eup %682  ;;  %688 = vrcp.f32 %v496_v17 }
 0x383   :  { %477 = vadd.xlane.f32.xlu0 %v683_v16 }
 0x386   :  { %v685_v18 = vpop.eup %684 }
 0x387   :  { %v494_v19 = vpop.xlane.xlu1 %493  ;;  %v535_v20 = vmul.f32 %v685_v18, %v1077_v41  ;;  %v687_v3 = vpop.eup %686 }
 0x388   :  { %690 = vrcp.f32 %v494_v19  ;;  %v534_v21 = vmul.f32 %v687_v3, %v1069_v33  ;;  %v689_v22 = vpop.eup %688  ;;  %v486_v30 = vpop.xlane.xlu2 %485 }
 0x389   :  { %543 = vmatpush.xpose.msra.mxu2 %v535_v20  ;;  %692 = vrcp.f32 %v492_v9  ;;  %v533_v24 = vmul.f32 %v689_v22, %v1065_v29  ;;  %v484_v33 = vpop.xlane.xlu0 %483 }
 0x38a   :  { %694 = vrcp.f32 %v490_v1 }
 0x38d   :  { %544 = vmatpush.xpose.msra.mxu2 %v534_v21 }
 0x38e   :  { %v691_v25 = vpop.eup %690 }
 0x38f   :  { %v532_v27 = vmul.f32 %v691_v25, %v1088_v49  ;;  %v693_v28 = vpop.eup %692 }
 0x390   :  { %v488_v26 = vpop.xlane.xlu1 %487  ;;  %v531_v31 = vmul.f32 %v693_v28, %v1081_v45  ;;  %v695_v32 = vpop.eup %694 }
 0x391   :  { %545 = vmatpush.xpose.msra.mxu2 %v533_v24  ;;  %696 = vrcp.f32 %v488_v26  ;;  %v530_v5 = vmul.f32 %v695_v32, %v1079_v23  ;;  %v480_v38 = vpop.xlane.xlu2 %479 }
 0x392   :  { %698 = vrcp.f32 %v486_v30 }
 0x393   :  { %700 = vrcp.f32 %v484_v33 }
 0x395   :  { %546 = vmatpush.xpose.msra.mxu2 %v532_v27 }
 0x397   :  { %v697_v34 = vpop.eup %696 }
 0x398   :  { %v482_v29 = vpop.xlane.xlu1 %481  ;;  %v529_v36 = vmul.f32 %v697_v34, %v1100_v57  ;;  %v699_v37 = vpop.eup %698 }
 0x399   :  { %547 = vmatpush.xpose.msra.mxu2 %v531_v31  ;;  %702 = vrcp.f32 %v482_v29  ;;  %v528_v39 = vmul.f32 %v699_v37, %v1092_v54  ;;  %v701_v40 = vpop.eup %700 }
 0x39a   :  { %704 = vrcp.f32 %v480_v38  ;;  %v527_v41 = vmul.f32 %v701_v40, %v1090_v51  ;;  %v539_v51 = vld [vmem:[%s1134_s1] sm:$0xff] }
 0x39d   :  { %548 = vmatpush.xpose.msra.mxu2 %v530_v5 }
 0x39f   :  { %v703_v42 = vpop.eup %702 }
 0x3a0   :  { %v526_v23 = vmul.f32 %v703_v42, %v1104_v58  ;;  %v705_v43 = vpop.eup %704 }
 0x3a1   :  { %549 = vmatpush.xpose.msra.mxu2 %v529_v36  ;;  %v525_v45 = vmul.f32 %v705_v43, %v1098_v56 }
 0x3a5   :  { %550 = vmatpush.xpose.msra.mxu2 %v528_v39 }
 0x3a9   :  { %551 = vmatpush.xpose.msra.mxu2 %v527_v41 }
 0x3ad   :  { %552 = vmatpush.xpose.msra.mxu2 %v526_v23 }
 0x3b1   :  { %553 = vmatpush.xpose.msra.mxu2 %v525_v45 }
 0x3ee   :  { %v476_v46 = vpop.xlane.xlu1 %475 }
 0x3f6   :  { %v478_v47 = vpop.xlane.xlu0 %477 }
 0x3f7   :  { %706 = vrcp.f32 %v478_v47 }
 0x3f8   :  { %708 = vrcp.f32 %v476_v46 }
 0x3fd   :  { %v707_v48 = vpop.eup %706 }
 0x3fe   :  { %v524_v49 = vmul.f32 %v707_v48, %v683_v16  ;;  %v709_v50 = vpop.eup %708 }
 0x3ff   :  { %v523_v52 = vmul.f32 %v709_v50, %v1110_v8 }
 0x400   :  { %554 = vmatpush.xpose.msra.mxu2 %v524_v49 }
 0x404   :  { %555 = vmatpush.xpose.msra.mxu2 %v523_v52 }
 0x407   :  { %556 = vmatmul.f32.vlgmr.msra.gmra.mxu2 %v539_v51 }
 0x48a   :  { %v557_v53 = vpop.f32.mrf.mxu2 }
 0x48b   :  { %560 = vst [vmem:[#allocation5] sm:$0xff] %v557_v53 }
 0x48c   :  { %571 = dma.vmem_to_hbm [thread:$0]  %s567_s10, 128, %s569_s13, [#allocation4]  }
 0x48d   :  { %760 = dma.done.wait [#allocation4], 128  }
 0x48e   :  { %761 = vsyncadd [#allocation4], 4294967168 }
 0x48f   :  { %576 = vsyncpa [#allocation3], 1 }
 0x490   :  { %577 = vsyncpa [#allocation4], 1 }

</bundles_post_ra>
